<compile_context>
chip_gen: v7x
topology: tpu7x:2x2x1
jax: 0.10.0
libtpu: 0.0.40
codegen_flags: <defaults>
</compile_context>

<pallas_src>
import functools

import jax
import jax.numpy as jnp
import numpy as np
from jax.experimental import pallas as pl
from jax.experimental.pallas import tpu as pltpu


# ----------------------------------------------------------------------------
# Parameter-only preprocessing (glue, plain JAX).
# ----------------------------------------------------------------------------
def resize_bilinear_ac(img, out_h, out_w):
    """Bilinear resize of the last two dims, PyTorch align_corners=True."""
    Hi, Wi = img.shape[-2], img.shape[-1]

    def coords(n_out, n_in):
        if n_out == 1:
            return jnp.zeros((1,), jnp.float32)
        return jnp.arange(n_out, dtype=jnp.float32) * ((n_in - 1) / (n_out - 1))

    ys = coords(out_h, Hi)
    xs = coords(out_w, Wi)
    y0 = jnp.clip(jnp.floor(ys).astype(jnp.int32), 0, Hi - 1)
    x0 = jnp.clip(jnp.floor(xs).astype(jnp.int32), 0, Wi - 1)
    y1 = jnp.clip(y0 + 1, 0, Hi - 1)
    x1 = jnp.clip(x0 + 1, 0, Wi - 1)
    wy = (ys - y0.astype(jnp.float32))[:, None]
    wx = (xs - x0.astype(jnp.float32))[None, :]
    Ia = img[..., y0[:, None], x0[None, :]]
    Ib = img[..., y0[:, None], x1[None, :]]
    Ic = img[..., y1[:, None], x0[None, :]]
    Id = img[..., y1[:, None], x1[None, :]]
    return (Ia * (1 - wy) * (1 - wx) + Ib * (1 - wy) * wx
            + Ic * wy * (1 - wx) + Id * wy * wx)


def dwconv2d_3x3(m, w):
    """Depthwise 3x3 conv, padding=1. m: (pd, H, W), w: (pd, 3, 3)."""
    pd, H, W = m.shape
    mp = jnp.pad(m, ((0, 0), (1, 1), (1, 1)))
    out = jnp.zeros_like(m)
    for i in range(3):
        for j in range(3):
            out = out + w[:, i, j][:, None, None] * mp[:, i:i + H, j:j + W]
    return out


def dwconv1d_3(m, w):
    """Depthwise size-3 1D conv, padding=1. m: (pd, L), w: (pd, 3)."""
    pd, L = m.shape
    mp = jnp.pad(m, ((0, 0), (1, 1)))
    out = jnp.zeros_like(m)
    for i in range(3):
        out = out + w[:, i][:, None] * mp[:, i:i + L]
    return out


def prepare_block_inputs(p, H, W, C):
    """Per-block parameter tensors in the kernel's (C, H*W) layout."""
    pd = C // 4
    HW = H * W
    # x1 branch: conv_hw(interpolate(hw)) -> per (c,h,w) scale
    mod_hw = dwconv2d_3x3(resize_bilinear_ac(p["hw"], H, W), p["conv_hw_w"])   # (pd,H,W)
    # x2 branch: conv_ch(interpolate(ch)) -> per (c,h) scale, broadcast over w
    mod_ch = dwconv1d_3(resize_bilinear_ac(p["ch"], pd, H), p["conv_ch_w"])    # (pd,H)
    # x3 branch: conv_cw(interpolate(cw)) -> per (c,w) scale, broadcast over h
    mod_cw = dwconv1d_3(resize_bilinear_ac(p["cw"], pd, W), p["conv_cw_w"])    # (pd,W)
    s = jnp.concatenate([
        mod_hw.reshape(pd, HW),
        jnp.broadcast_to(mod_ch[:, :, None], (pd, H, W)).reshape(pd, HW),
        jnp.broadcast_to(mod_cw[:, None, :], (pd, H, W)).reshape(pd, HW),
        jnp.zeros((pd, HW), jnp.float32),      # x4 group handled by the matmul
    ], axis=0).astype(jnp.float32)             # (C, HW)
    # extended 1x1 conv (only maps the last pd channels onto the last pd)
    # TODO(synk): when pd is sublane-aligned and large (C >= 512) a dense
    # pd x pd matmul on the last channel group would avoid 15/16 zero-FLOPs.
    w4_ext = jnp.zeros((C, C), jnp.float32).at[3 * pd:, 3 * pd:].set(p["w4"])
    ln = jnp.stack([p["g1"], p["b1"], p["g2"], p["b2"]], axis=1)               # (C, 4)
    wdw = p["mlp_dw_w"].reshape(C, 9).astype(jnp.float32)                      # (C, 9)
    return s, w4_ext, ln.astype(jnp.float32), wdw, p["mlp_pw_w"].astype(jnp.float32)


def prepare_layer_inputs(params, H, W, C):
    """Stack per-block tensors over depth + build the 3x3-tap edge masks."""
    per = [prepare_block_inputs(p, H, W, C) for p in params]
    s_all, w4_all, ln_all, wdw_all, wp_all = (jnp.stack(list(t)) for t in zip(*per))

    # 0/1 edge masks for the 9 depthwise taps in the flattened (H*W) layout.
    hh, ww = jnp.meshgrid(jnp.arange(H), jnp.arange(W), indexing="ij")
    hh = hh.reshape(-1)
    ww = ww.reshape(-1)
    rows = []
    for i in range(3):
        for j in range(3):
            m = jnp.ones((H * W,), jnp.float32)
            if i == 0:
                m = m * (hh >= 1)
            if i == 2:
                m = m * (hh <= H - 2)
            if j == 0:
                m = m * (ww >= 1)
            if j == 2:
                m = m * (ww <= W - 2)
            rows.append(m)
    masks = jnp.stack(rows, axis=0).astype(jnp.float32)                        # (9, HW)
    return dict(s=s_all, w4=w4_all, ln=ln_all, wdw=wdw_all, wp=wp_all, masks=masks)


# ----------------------------------------------------------------------------
# Pallas kernel: the whole BasicLayer stack on one batch element.
# grid = (N, depth); the activation (C, H*W) stays resident in VMEM scratch
# across the depth axis, so x is read from / written to HBM exactly once.
# ----------------------------------------------------------------------------
def basic_layer_kernel(x_ref, s_ref, w4_ref, ln_ref, wdw_ref, wp_ref, mask_ref,
                       o_ref, act_ref, *, H, W, eps, mm_dtype):
    d = pl.program_id(1)
    nd = pl.num_programs(1)

    @pl.when(d == 0)
    def _():
        act_ref[...] = x_ref[0]                       # load this batch element once

    x_in = act_ref[...]                               # (C, HW) f32
    C, HW = x_in.shape

    ln = ln_ref[0]                                    # (C, 4): g1, b1, g2, b2 columns
    g1, b1 = ln[:, 0:1], ln[:, 1:2]
    g2, b2 = ln[:, 2:3], ln[:, 3:4]

    # ---- norm1: LayerNorm over channels = sublane reduce (biased variance) ----
    mu = jnp.mean(x_in, axis=0, keepdims=True)
    xc = x_in - mu
    var = jnp.mean(xc * xc, axis=0, keepdims=True)
    y = xc * jax.lax.rsqrt(var + eps) * g1 + b1

    # ---- branches: x1/x2/x3 elementwise modulation + x4 1x1 conv (matmul) ----
    z = y * s_ref[0]
    z = z + jnp.dot(w4_ref[0].astype(mm_dtype), y.astype(mm_dtype),
                    preferred_element_type=jnp.float32)

    # ---- norm2 ----
    mu2 = jnp.mean(z, axis=0, keepdims=True)
    zc = z - mu2
    var2 = jnp.mean(zc * zc, axis=0, keepdims=True)
    z = zc * jax.lax.rsqrt(var2 + eps) * g2 + b2

    # ---- MLP depthwise 3x3 conv: lane rolls (XLU) + precomputed edge masks ----
    wdw = wdw_ref[0]                                  # (C, 9), per-channel taps
    acc = z * wdw[:, 4:5]                             # center tap (i=1, j=1)
    for i in range(3):
        for j in range(3):
            if i == 1 and j == 1:
                continue
            k = i * 3 + j
            shift = (-((i - 1) * W + (j - 1))) % HW   # out[p] = z[p + s]
            rolled = pltpu.roll(z, shift=shift, axis=1)
            acc = acc + rolled * mask_ref[k:k + 1, :] * wdw[:, k:k + 1]
    acc = jnp.maximum(acc, 0.0)

    # ---- MLP 1x1 conv (matmul) + residual ----
    out = jnp.dot(wp_ref[0].astype(mm_dtype), acc.astype(mm_dtype),
                  preferred_element_type=jnp.float32) + x_in

    @pl.when(d < nd - 1)
    def _():
        act_ref[...] = out                            # carry to the next block

    @pl.when(d == nd - 1)
    def _():
        o_ref[0] = out                                # single lane-dense writeback


def basic_layer_forward(x_nchw, params):
    """x_nchw: (N, C, H, W) float32; applies all MPQLB blocks in one kernel."""
    N, C, H, W = x_nchw.shape
    assert C % 4 == 0, "dim must be divisible by 4"
    depth = len(params)
    HW = H * W
    ins = prepare_layer_inputs(params, H, W, C)
    x2d = x_nchw.reshape(N, C, HW).astype(jnp.float32)

    kernel = functools.partial(
        basic_layer_kernel, H=H, W=W, eps=1e-6,
        mm_dtype=(jnp.bfloat16 if C >= 128 else jnp.float32))

    out = pl.pallas_call(
        kernel,
        out_shape=jax.ShapeDtypeStruct((N, C, HW), jnp.float32),
        grid=(N, depth),
        in_specs=[
            pl.BlockSpec((1, C, HW), lambda n, d: (n, 0, 0)),   # x (resident per n)
            pl.BlockSpec((1, C, HW), lambda n, d: (d, 0, 0)),   # modulation scales
            pl.BlockSpec((1, C, C), lambda n, d: (d, 0, 0)),    # extended conv_4
            pl.BlockSpec((1, C, 4), lambda n, d: (d, 0, 0)),    # LN gamma/beta x2
            pl.BlockSpec((1, C, 9), lambda n, d: (d, 0, 0)),    # depthwise 3x3 w
            pl.BlockSpec((1, C, C), lambda n, d: (d, 0, 0)),    # pointwise 1x1 w
            pl.BlockSpec((9, HW), lambda n, d: (0, 0)),         # edge masks (shared)
        ],
        out_specs=pl.BlockSpec((1, C, HW), lambda n, d: (n, 0, 0)),
        scratch_shapes=[pltpu.VMEM((C, HW), jnp.float32)],      # resident activation
        compiler_params=pltpu.CompilerParams(
            dimension_semantics=("parallel", "arbitrary")),
    )(x2d, ins["s"], ins["w4"], ins["ln"], ins["wdw"], ins["wp"], ins["masks"])

    return out.reshape(N, C, H, W)


# ----------------------------------------------------------------------------
# Plain-JAX NCHW reference (mirrors the PyTorch forward) for correctness check.
# ----------------------------------------------------------------------------
def mpqlb_ref(x, p, eps=1e-6):
    N, C, H, W = x.shape
    pd = C // 4
    mu = x.mean(1, keepdims=True)
    var = ((x - mu) ** 2).mean(1, keepdims=True)
    y = (x - mu) / jnp.sqrt(var + eps)
    y = p["g1"].reshape(1, C, 1, 1) * y + p["b1"].reshape(1, C, 1, 1)
    y1, y2, y3, y4 = jnp.split(y, 4, axis=1)
    mod_hw = dwconv2d_3x3(resize_bilinear_ac(p["hw"], H, W), p["conv_hw_w"])
    mod_ch = dwconv1d_3(resize_bilinear_ac(p["ch"], pd, H), p["conv_ch_w"])
    mod_cw = dwconv1d_3(resize_bilinear_ac(p["cw"], pd, W), p["conv_cw_w"])
    x1 = y1 * mod_hw[None]
    x2 = y2 * mod_ch[None, :, :, None]
    x3 = y3 * mod_cw[None, :, None, :]
    x4 = jnp.einsum("oc,nchw->nohw", p["w4"], y4)
    z = jnp.concatenate([x1, x2, x3, x4], axis=1)
    mu2 = z.mean(1, keepdims=True)
    var2 = ((z - mu2) ** 2).mean(1, keepdims=True)
    z = (z - mu2) / jnp.sqrt(var2 + eps)
    z = p["g2"].reshape(1, C, 1, 1) * z + p["b2"].reshape(1, C, 1, 1)
    zp = jnp.pad(z, ((0, 0), (0, 0), (1, 1), (1, 1)))
    acc = jnp.zeros_like(z)
    for i in range(3):
        for j in range(3):
            acc = acc + p["mlp_dw_w"][:, i, j].reshape(1, C, 1, 1) * zp[:, :, i:i + H, j:j + W]
    acc = jnp.maximum(acc, 0.0)
    return jnp.einsum("oc,nchw->nohw", p["mlp_pw_w"], acc) + x


def basic_layer_ref(x_nchw, params):
    x = x_nchw.astype(jnp.float32)
    for p in params:
        x = mpqlb_ref(x, p)
    return x


# ----------------------------------------------------------------------------
# Synthetic deterministic params (torch shapes; MPQLB(dim, x=dim, y=8), no bias)
# ----------------------------------------------------------------------------
def init_block_params(key, dim):
    pd = dim // 4
    keys = jax.random.split(key, 6)
    return dict(
        hw=jnp.ones((pd, dim, 8), jnp.float32),           # torch: (1, pd, dim, 8), ones
        ch=jnp.ones((pd, dim), jnp.float32),               # torch: (1, 1, pd, dim), ones
        cw=jnp.ones((pd, 8), jnp.float32),                 # torch: (1, 1, pd, 8), ones
        conv_hw_w=0.2 * jax.random.normal(keys[0], (pd, 3, 3), jnp.float32),
        conv_ch_w=0.2 * jax.random.normal(keys[1], (pd, 3), jnp.float32),
        conv_cw_w=0.2 * jax.random.normal(keys[2], (pd, 3), jnp.float32),
        w4=0.2 * jax.random.normal(keys[3], (pd, pd), jnp.float32),   # conv_4 (out, in)
        g1=jnp.ones((dim,), jnp.float32), b1=jnp.zeros((dim,), jnp.float32),
        g2=jnp.ones((dim,), jnp.float32), b2=jnp.zeros((dim,), jnp.float32),
        mlp_dw_w=0.2 * jax.random.normal(keys[4], (dim, 3, 3), jnp.float32),
        mlp_pw_w=0.2 * jax.random.normal(keys[5], (dim, dim), jnp.float32),
    )


if __name__ == "__main__":
    key = jax.random.PRNGKey(0)
    dim, depth = 8, 2          # dim must be divisible by 4
    N, H, W = 2, 16, 16
    kx, kp = jax.random.split(key)
    x = jax.random.normal(kx, (N, dim, H, W), jnp.float32)   # NCHW, like PyTorch

    block_keys = jax.random.split(kp, depth)
    params = [init_block_params(k, dim) for k in block_keys]

    out = basic_layer_forward(x, params)
    out = jax.block_until_ready(out)
    assert out.shape == x.shape and out.dtype == jnp.float32

    ref = basic_layer_ref(x, params)
    np.testing.assert_allclose(np.asarray(out), np.asarray(ref), rtol=5e-2, atol=5e-2)

    print("KERNEL_OK")
</pallas_src>

<mosaic_0001>
module attributes {stable_mosaic.version = 11 : i64} {
  func.func @basic_layer_kernel(%arg0: i32, %arg1: i32, %arg2: memref<1x8x256xf32, #tpu.memory_space<vmem>>, %arg3: memref<1x8x256xf32, #tpu.memory_space<vmem>>, %arg4: memref<1x8x8xf32, #tpu.memory_space<vmem>>, %arg5: memref<1x8x4xf32, #tpu.memory_space<vmem>>, %arg6: memref<1x8x9xf32, #tpu.memory_space<vmem>>, %arg7: memref<1x8x8xf32, #tpu.memory_space<vmem>>, %arg8: memref<9x256xf32, #tpu.memory_space<vmem>>, %arg9: memref<1x8x256xf32, #tpu.memory_space<vmem>>, %arg10: memref<8x256xf32, #tpu.memory_space<vmem>>) attributes {dimension_semantics = [#tpu.dimension_semantics<parallel>, #tpu.dimension_semantics<arbitrary>], iteration_bounds = array<i64: 2, 2>, scalar_prefetch = 0 : i64, scratch_operands = 1 : i64, tpu.core_type = #tpu.core_type<tc>, window_params = [{transform_indices = @transform_0, window_bounds = array<i64: 1, 8, 256>}, {transform_indices = @transform_1, window_bounds = array<i64: 1, 8, 256>}, {transform_indices = @transform_2, window_bounds = array<i64: 1, 8, 8>}, {transform_indices = @transform_3, window_bounds = array<i64: 1, 8, 4>}, {transform_indices = @transform_4, window_bounds = array<i64: 1, 8, 9>}, {transform_indices = @transform_5, window_bounds = array<i64: 1, 8, 8>}, {pipeline_mode = #tpu.pipeline_mode<synchronous>, transform_indices = @transform_6, window_bounds = array<i64: 9, 256>}, {transform_indices = @transform_7, window_bounds = array<i64: 1, 8, 256>}]} {
    %c0_i32 = arith.constant 0 : i32
    %0 = arith.cmpi eq, %arg1, %c0_i32 : i32
    %1 = arith.extui %0 : i1 to i32
    %c0_i32_0 = arith.constant 0 : i32
    %2 = arith.cmpi ne, %1, %c0_i32_0 : i32
    scf.if %2 {
      %c0_42 = arith.constant 0 : index
      %c0_43 = arith.constant 0 : index
      %c0_44 = arith.constant 0 : index
      %138 = vector.load %arg2[%c0_42, %c0_43, %c0_44] : memref<1x8x256xf32, #tpu.memory_space<vmem>>, vector<1x8x256xf32>
      %139 = vector.shape_cast %138 : vector<1x8x256xf32> to vector<8x256xf32>
      %c0_45 = arith.constant 0 : index
      %c0_46 = arith.constant 0 : index
      %140 = vector.load %arg10[%c0_45, %c0_46] : memref<8x256xf32, #tpu.memory_space<vmem>>, vector<8x256xf32>
      tpu.vector_store %arg10[%c0_45, %c0_46], %139 {strides = array<i32>} : memref<8x256xf32, #tpu.memory_space<vmem>>, vector<8x256xf32>,
    } else {
    }
    %c0 = arith.constant 0 : index
    %c0_1 = arith.constant 0 : index
    %3 = vector.load %arg10[%c0, %c0_1] : memref<8x256xf32, #tpu.memory_space<vmem>>, vector<8x256xf32>
    %c0_2 = arith.constant 0 : index
    %c0_3 = arith.constant 0 : index
    %c0_4 = arith.constant 0 : index
    %4 = vector.load %arg5[%c0_2, %c0_3, %c0_4] : memref<1x8x4xf32, #tpu.memory_space<vmem>>, vector<1x8x4xf32>
    %5 = vector.shape_cast %4 : vector<1x8x4xf32> to vector<8x4xf32>
    %6 = vector.extract_strided_slice %5 {offsets = [0, 0], sizes = [8, 1], strides = [1, 1]} : vector<8x4xf32> to vector<8x1xf32>
    %7 = vector.extract_strided_slice %5 {offsets = [0, 1], sizes = [8, 1], strides = [1, 1]} : vector<8x4xf32> to vector<8x1xf32>
    %8 = vector.extract_strided_slice %5 {offsets = [0, 2], sizes = [8, 1], strides = [1, 1]} : vector<8x4xf32> to vector<8x1xf32>
    %9 = vector.extract_strided_slice %5 {offsets = [0, 3], sizes = [8, 1], strides = [1, 1]} : vector<8x4xf32> to vector<8x1xf32>
    %cst = arith.constant dense<0.000000e+00> : vector<256xf32>
    %10 = vector.multi_reduction <add>, %3, %cst [0] : vector<8x256xf32> to vector<256xf32>
    %11 = vector.shape_cast %10 : vector<256xf32> to vector<1x256xf32>
    %cst_5 = arith.constant 8.000000e+00 : f32
    %12 = vector.broadcast %cst_5 : f32 to vector<1x256xf32>
    %13 = arith.divf %11, %12 : vector<1x256xf32>
    %14 = vector.broadcast %13 : vector<1x256xf32> to vector<8x256xf32>
    %15 = arith.subf %3, %14 : vector<8x256xf32>
    %16 = arith.mulf %15, %15 : vector<8x256xf32>
    %cst_6 = arith.constant dense<0.000000e+00> : vector<256xf32>
    %17 = vector.multi_reduction <add>, %16, %cst_6 [0] : vector<8x256xf32> to vector<256xf32>
    %18 = vector.shape_cast %17 : vector<256xf32> to vector<1x256xf32>
    %cst_7 = arith.constant 8.000000e+00 : f32
    %19 = vector.broadcast %cst_7 : f32 to vector<1x256xf32>
    %20 = arith.divf %18, %19 : vector<1x256xf32>
    %cst_8 = arith.constant 9.99999997E-7 : f32
    %21 = vector.broadcast %cst_8 : f32 to vector<1x256xf32>
    %22 = arith.addf %20, %21 : vector<1x256xf32>
    %23 = math.rsqrt %22 : vector<1x256xf32>
    %24 = vector.broadcast %23 : vector<1x256xf32> to vector<8x256xf32>
    %25 = arith.mulf %15, %24 : vector<8x256xf32>
    %26 = vector.broadcast %6 : vector<8x1xf32> to vector<8x256xf32>
    %27 = arith.mulf %25, %26 : vector<8x256xf32>
    %28 = vector.broadcast %7 : vector<8x1xf32> to vector<8x256xf32>
    %29 = arith.addf %27, %28 : vector<8x256xf32>
    %c0_9 = arith.constant 0 : index
    %c0_10 = arith.constant 0 : index
    %c0_11 = arith.constant 0 : index
    %30 = vector.load %arg3[%c0_9, %c0_10, %c0_11] : memref<1x8x256xf32, #tpu.memory_space<vmem>>, vector<1x8x256xf32>
    %31 = vector.shape_cast %30 : vector<1x8x256xf32> to vector<8x256xf32>
    %32 = arith.mulf %29, %31 : vector<8x256xf32>
    %c0_12 = arith.constant 0 : index
    %c0_13 = arith.constant 0 : index
    %c0_14 = arith.constant 0 : index
    %33 = vector.load %arg4[%c0_12, %c0_13, %c0_14] : memref<1x8x8xf32, #tpu.memory_space<vmem>>, vector<1x8x8xf32>
    %34 = vector.shape_cast %33 : vector<1x8x8xf32> to vector<8x8xf32>
    %cst_15 = arith.constant dense<0.000000e+00> : vector<8x256xf32>
    %35 = tpu.matmul %34, %29, %cst_15 {dimension_numbers = #tpu.dot_dimension_numbers<[1], [0], [0], [1], [0, 0, 1, 1], [], []>} : vector<8x8xf32>, vector<8x256xf32>, vector<8x256xf32> -> vector<8x256xf32>
    %36 = arith.addf %32, %35 : vector<8x256xf32>
    %cst_16 = arith.constant dense<0.000000e+00> : vector<256xf32>
    %37 = vector.multi_reduction <add>, %36, %cst_16 [0] : vector<8x256xf32> to vector<256xf32>
    %38 = vector.shape_cast %37 : vector<256xf32> to vector<1x256xf32>
    %cst_17 = arith.constant 8.000000e+00 : f32
    %39 = vector.broadcast %cst_17 : f32 to vector<1x256xf32>
    %40 = arith.divf %38, %39 : vector<1x256xf32>
    %41 = vector.broadcast %40 : vector<1x256xf32> to vector<8x256xf32>
    %42 = arith.subf %36, %41 : vector<8x256xf32>
    %43 = arith.mulf %42, %42 : vector<8x256xf32>
    %cst_18 = arith.constant dense<0.000000e+00> : vector<256xf32>
    %44 = vector.multi_reduction <add>, %43, %cst_18 [0] : vector<8x256xf32> to vector<256xf32>
    %45 = vector.shape_cast %44 : vector<256xf32> to vector<1x256xf32>
    %cst_19 = arith.constant 8.000000e+00 : f32
    %46 = vector.broadcast %cst_19 : f32 to vector<1x256xf32>
    %47 = arith.divf %45, %46 : vector<1x256xf32>
    %cst_20 = arith.constant 9.99999997E-7 : f32
    %48 = vector.broadcast %cst_20 : f32 to vector<1x256xf32>
    %49 = arith.addf %47, %48 : vector<1x256xf32>
    %50 = math.rsqrt %49 : vector<1x256xf32>
    %51 = vector.broadcast %50 : vector<1x256xf32> to vector<8x256xf32>
    %52 = arith.mulf %42, %51 : vector<8x256xf32>
    %53 = vector.broadcast %8 : vector<8x1xf32> to vector<8x256xf32>
    %54 = arith.mulf %52, %53 : vector<8x256xf32>
    %55 = vector.broadcast %9 : vector<8x1xf32> to vector<8x256xf32>
    %56 = arith.addf %54, %55 : vector<8x256xf32>
    %c0_21 = arith.constant 0 : index
    %c0_22 = arith.constant 0 : index
    %c0_23 = arith.constant 0 : index
    %57 = vector.load %arg6[%c0_21, %c0_22, %c0_23] : memref<1x8x9xf32, #tpu.memory_space<vmem>>, vector<1x8x9xf32>
    %58 = vector.shape_cast %57 : vector<1x8x9xf32> to vector<8x9xf32>
    %59 = vector.extract_strided_slice %58 {offsets = [0, 4], sizes = [8, 1], strides = [1, 1]} : vector<8x9xf32> to vector<8x1xf32>
    %60 = vector.broadcast %59 : vector<8x1xf32> to vector<8x256xf32>
    %61 = arith.mulf %56, %60 : vector<8x256xf32>
    %c17_i32 = arith.constant 17 : i32
    %62 = tpu.dynamic_rotate %56 by %c17_i32 dim 1 : vector<8x256xf32>, i32 -> vector<8x256xf32>
    %c0_24 = arith.constant 0 : index
    %c0_25 = arith.constant 0 : index
    %63 = vector.load %arg8[%c0_24, %c0_25] : memref<9x256xf32, #tpu.memory_space<vmem>>, vector<1x256xf32>
    %64 = vector.broadcast %63 : vector<1x256xf32> to vector<8x256xf32>
    %65 = arith.mulf %62, %64 : vector<8x256xf32>
    %66 = vector.extract_strided_slice %58 {offsets = [0, 0], sizes = [8, 1], strides = [1, 1]} : vector<8x9xf32> to vector<8x1xf32>
    %67 = vector.broadcast %66 : vector<8x1xf32> to vector<8x256xf32>
    %68 = arith.mulf %65, %67 : vector<8x256xf32>
    %69 = arith.addf %61, %68 : vector<8x256xf32>
    %c16_i32 = arith.constant 16 : i32
    %70 = tpu.dynamic_rotate %56 by %c16_i32 dim 1 : vector<8x256xf32>, i32 -> vector<8x256xf32>
    %c1 = arith.constant 1 : index
    %c0_26 = arith.constant 0 : index
    %71 = vector.load %arg8[%c1, %c0_26] : memref<9x256xf32, #tpu.memory_space<vmem>>, vector<1x256xf32>
    %72 = vector.broadcast %71 : vector<1x256xf32> to vector<8x256xf32>
    %73 = arith.mulf %70, %72 : vector<8x256xf32>
    %74 = vector.extract_strided_slice %58 {offsets = [0, 1], sizes = [8, 1], strides = [1, 1]} : vector<8x9xf32> to vector<8x1xf32>
    %75 = vector.broadcast %74 : vector<8x1xf32> to vector<8x256xf32>
    %76 = arith.mulf %73, %75 : vector<8x256xf32>
    %77 = arith.addf %69, %76 : vector<8x256xf32>
    %c15_i32 = arith.constant 15 : i32
    %78 = tpu.dynamic_rotate %56 by %c15_i32 dim 1 : vector<8x256xf32>, i32 -> vector<8x256xf32>
    %c2 = arith.constant 2 : index
    %c0_27 = arith.constant 0 : index
    %79 = vector.load %arg8[%c2, %c0_27] : memref<9x256xf32, #tpu.memory_space<vmem>>, vector<1x256xf32>
    %80 = vector.broadcast %79 : vector<1x256xf32> to vector<8x256xf32>
    %81 = arith.mulf %78, %80 : vector<8x256xf32>
    %82 = vector.extract_strided_slice %58 {offsets = [0, 2], sizes = [8, 1], strides = [1, 1]} : vector<8x9xf32> to vector<8x1xf32>
    %83 = vector.broadcast %82 : vector<8x1xf32> to vector<8x256xf32>
    %84 = arith.mulf %81, %83 : vector<8x256xf32>
    %85 = arith.addf %77, %84 : vector<8x256xf32>
    %c1_i32 = arith.constant 1 : i32
    %86 = tpu.dynamic_rotate %56 by %c1_i32 dim 1 : vector<8x256xf32>, i32 -> vector<8x256xf32>
    %c3 = arith.constant 3 : index
    %c0_28 = arith.constant 0 : index
    %87 = vector.load %arg8[%c3, %c0_28] : memref<9x256xf32, #tpu.memory_space<vmem>>, vector<1x256xf32>
    %88 = vector.broadcast %87 : vector<1x256xf32> to vector<8x256xf32>
    %89 = arith.mulf %86, %88 : vector<8x256xf32>
    %90 = vector.extract_strided_slice %58 {offsets = [0, 3], sizes = [8, 1], strides = [1, 1]} : vector<8x9xf32> to vector<8x1xf32>
    %91 = vector.broadcast %90 : vector<8x1xf32> to vector<8x256xf32>
    %92 = arith.mulf %89, %91 : vector<8x256xf32>
    %93 = arith.addf %85, %92 : vector<8x256xf32>
    %c255_i32 = arith.constant 255 : i32
    %94 = tpu.dynamic_rotate %56 by %c255_i32 dim 1 : vector<8x256xf32>, i32 -> vector<8x256xf32>
    %c5 = arith.constant 5 : index
    %c0_29 = arith.constant 0 : index
    %95 = vector.load %arg8[%c5, %c0_29] : memref<9x256xf32, #tpu.memory_space<vmem>>, vector<1x256xf32>
    %96 = vector.broadcast %95 : vector<1x256xf32> to vector<8x256xf32>
    %97 = arith.mulf %94, %96 : vector<8x256xf32>
    %98 = vector.extract_strided_slice %58 {offsets = [0, 5], sizes = [8, 1], strides = [1, 1]} : vector<8x9xf32> to vector<8x1xf32>
    %99 = vector.broadcast %98 : vector<8x1xf32> to vector<8x256xf32>
    %100 = arith.mulf %97, %99 : vector<8x256xf32>
    %101 = arith.addf %93, %100 : vector<8x256xf32>
    %c241_i32 = arith.constant 241 : i32
    %102 = tpu.dynamic_rotate %56 by %c241_i32 dim 1 : vector<8x256xf32>, i32 -> vector<8x256xf32>
    %c6 = arith.constant 6 : index
    %c0_30 = arith.constant 0 : index
    %103 = vector.load %arg8[%c6, %c0_30] : memref<9x256xf32, #tpu.memory_space<vmem>>, vector<1x256xf32>
    %104 = vector.broadcast %103 : vector<1x256xf32> to vector<8x256xf32>
    %105 = arith.mulf %102, %104 : vector<8x256xf32>
    %106 = vector.extract_strided_slice %58 {offsets = [0, 6], sizes = [8, 1], strides = [1, 1]} : vector<8x9xf32> to vector<8x1xf32>
    %107 = vector.broadcast %106 : vector<8x1xf32> to vector<8x256xf32>
    %108 = arith.mulf %105, %107 : vector<8x256xf32>
    %109 = arith.addf %101, %108 : vector<8x256xf32>
    %c240_i32 = arith.constant 240 : i32
    %110 = tpu.dynamic_rotate %56 by %c240_i32 dim 1 : vector<8x256xf32>, i32 -> vector<8x256xf32>
    %c7 = arith.constant 7 : index
    %c0_31 = arith.constant 0 : index
    %111 = vector.load %arg8[%c7, %c0_31] : memref<9x256xf32, #tpu.memory_space<vmem>>, vector<1x256xf32>
    %112 = vector.broadcast %111 : vector<1x256xf32> to vector<8x256xf32>
    %113 = arith.mulf %110, %112 : vector<8x256xf32>
    %114 = vector.extract_strided_slice %58 {offsets = [0, 7], sizes = [8, 1], strides = [1, 1]} : vector<8x9xf32> to vector<8x1xf32>
    %115 = vector.broadcast %114 : vector<8x1xf32> to vector<8x256xf32>
    %116 = arith.mulf %113, %115 : vector<8x256xf32>
    %117 = arith.addf %109, %116 : vector<8x256xf32>
    %c239_i32 = arith.constant 239 : i32
    %118 = tpu.dynamic_rotate %56 by %c239_i32 dim 1 : vector<8x256xf32>, i32 -> vector<8x256xf32>
    %c8 = arith.constant 8 : index
    %c0_32 = arith.constant 0 : index
    %119 = vector.load %arg8[%c8, %c0_32] : memref<9x256xf32, #tpu.memory_space<vmem>>, vector<1x256xf32>
    %120 = vector.broadcast %119 : vector<1x256xf32> to vector<8x256xf32>
    %121 = arith.mulf %118, %120 : vector<8x256xf32>
    %122 = vector.extract_strided_slice %58 {offsets = [0, 8], sizes = [8, 1], strides = [1, 1]} : vector<8x9xf32> to vector<8x1xf32>
    %123 = vector.broadcast %122 : vector<8x1xf32> to vector<8x256xf32>
    %124 = arith.mulf %121, %123 : vector<8x256xf32>
    %125 = arith.addf %117, %124 : vector<8x256xf32>
    %cst_33 = arith.constant 0.000000e+00 : f32
    %126 = vector.broadcast %cst_33 : f32 to vector<8x256xf32>
    %127 = arith.maximumf %125, %126 : vector<8x256xf32>
    %c0_34 = arith.constant 0 : index
    %c0_35 = arith.constant 0 : index
    %c0_36 = arith.constant 0 : index
    %128 = vector.load %arg7[%c0_34, %c0_35, %c0_36] : memref<1x8x8xf32, #tpu.memory_space<vmem>>, vector<1x8x8xf32>
    %129 = vector.shape_cast %128 : vector<1x8x8xf32> to vector<8x8xf32>
    %cst_37 = arith.constant dense<0.000000e+00> : vector<8x256xf32>
    %130 = tpu.matmul %129, %127, %cst_37 {dimension_numbers = #tpu.dot_dimension_numbers<[1], [0], [0], [1], [0, 0, 1, 1], [], []>} : vector<8x8xf32>, vector<8x256xf32>, vector<8x256xf32> -> vector<8x256xf32>
    %131 = arith.addf %130, %3 : vector<8x256xf32>
    %c1_i32_38 = arith.constant 1 : i32
    %132 = arith.cmpi slt, %arg1, %c1_i32_38 : i32
    %133 = arith.extui %132 : i1 to i32
    %c0_i32_39 = arith.constant 0 : i32
    %134 = arith.cmpi ne, %133, %c0_i32_39 : i32
    scf.if %134 {
      %c0_42 = arith.constant 0 : index
      %c0_43 = arith.constant 0 : index
      %138 = vector.load %arg10[%c0_42, %c0_43] : memref<8x256xf32, #tpu.memory_space<vmem>>, vector<8x256xf32>
      tpu.vector_store %arg10[%c0_42, %c0_43], %131 {strides = array<i32>} : memref<8x256xf32, #tpu.memory_space<vmem>>, vector<8x256xf32>,
    } else {
    }
    %c1_i32_40 = arith.constant 1 : i32
    %135 = arith.cmpi eq, %arg1, %c1_i32_40 : i32
    %136 = arith.extui %135 : i1 to i32
    %c0_i32_41 = arith.constant 0 : i32
    %137 = arith.cmpi ne, %136, %c0_i32_41 : i32
    scf.if %137 {
      %c0_42 = arith.constant 0 : index
      %c0_43 = arith.constant 0 : index
      %c0_44 = arith.constant 0 : index
      %138 = vector.load %arg9[%c0_42, %c0_43, %c0_44] : memref<1x8x256xf32, #tpu.memory_space<vmem>>, vector<1x8x256xf32>
      %139 = vector.shape_cast %138 : vector<1x8x256xf32> to vector<8x256xf32>
      %140 = vector.shape_cast %131 : vector<8x256xf32> to vector<1x8x256xf32>
      tpu.vector_store %arg9[%c0_42, %c0_43, %c0_44], %140 {strides = array<i32>} : memref<1x8x256xf32, #tpu.memory_space<vmem>>, vector<1x8x256xf32>,
    } else {
    }
    return
  }
  func.func @transform_0(%arg0: i32, %arg1: i32) -> (i32, i32, i32) {
    %c0_i32 = arith.constant 0 : i32
    %c0_i32_0 = arith.constant 0 : i32
    %c0_i32_1 = arith.constant 0 : i32
    return %arg0, %c0_i32, %c0_i32_0 : i32, i32, i32
  }
  func.func @transform_1(%arg0: i32, %arg1: i32) -> (i32, i32, i32) {
    %c0_i32 = arith.constant 0 : i32
    %c0_i32_0 = arith.constant 0 : i32
    %c0_i32_1 = arith.constant 0 : i32
    return %arg1, %c0_i32, %c0_i32_0 : i32, i32, i32
  }
  func.func @transform_2(%arg0: i32, %arg1: i32) -> (i32, i32, i32) {
    %c0_i32 = arith.constant 0 : i32
    %c0_i32_0 = arith.constant 0 : i32
    %c0_i32_1 = arith.constant 0 : i32
    return %arg1, %c0_i32, %c0_i32_0 : i32, i32, i32
  }
  func.func @transform_3(%arg0: i32, %arg1: i32) -> (i32, i32, i32) {
    %c0_i32 = arith.constant 0 : i32
    %c0_i32_0 = arith.constant 0 : i32
    %c0_i32_1 = arith.constant 0 : i32
    return %arg1, %c0_i32, %c0_i32_0 : i32, i32, i32
  }
  func.func @transform_4(%arg0: i32, %arg1: i32) -> (i32, i32, i32) {
    %c0_i32 = arith.constant 0 : i32
    %c0_i32_0 = arith.constant 0 : i32
    %c0_i32_1 = arith.constant 0 : i32
    return %arg1, %c0_i32, %c0_i32_0 : i32, i32, i32
  }
  func.func @transform_5(%arg0: i32, %arg1: i32) -> (i32, i32, i32) {
    %c0_i32 = arith.constant 0 : i32
    %c0_i32_0 = arith.constant 0 : i32
    %c0_i32_1 = arith.constant 0 : i32
    return %arg1, %c0_i32, %c0_i32_0 : i32, i32, i32
  }
  func.func @transform_6(%arg0: i32, %arg1: i32) -> (i32, i32) {
    %c0_i32 = arith.constant 0 : i32
    %c0_i32_0 = arith.constant 0 : i32
    %c0_i32_1 = arith.constant 0 : i32
    return %c0_i32, %c0_i32_0 : i32, i32
  }
  func.func @transform_7(%arg0: i32, %arg1: i32) -> (i32, i32, i32) {
    %c0_i32 = arith.constant 0 : i32
    %c0_i32_0 = arith.constant 0 : i32
    %c0_i32_1 = arith.constant 0 : i32
    return %arg0, %c0_i32, %c0_i32_0 : i32, i32, i32
  }
}

</mosaic_0001>

<bundles_post_ra>
// kernel: tpu_custom_call.1
= control target key start
LH: loop header
LB: loop body
LE: loop exit
PB: predicated region body
PF: predicated region fallthrough
CT: control target
= control target key end

     0   :  { %s2316_s0 = inlined_call_operand.hbm [shape: f32[2,8,256], index: 0, kind: input, shape index: {}]   ;;  %s2317_s1 = inlined_call_operand.hbm [shape: f32[2,8,256], index: 1, kind: input, shape index: {}]   ;;  %s2318_s2 = inlined_call_operand.hbm [shape: f32[2,8,8], index: 2, kind: input, shape index: {}]   ;;  %s2319_s3 = inlined_call_operand.vmem [shape: f32[2,8,4], index: 3, kind: input, shape index: {}]   ;;  %s2320_s4 = inlined_call_operand.hbm [shape: f32[2,8,9], index: 4, kind: input, shape index: {}]   ;;  %s2321_s5 = inlined_call_operand.hbm [shape: f32[2,8,8], index: 5, kind: input, shape index: {}]   ;;  %s2322_s6 = inlined_call_operand.vmem [shape: f32[9,256], index: 6, kind: input, shape index: {}]   ;;  %s2323_s7 = inlined_call_operand.hbm [shape: f32[2,8,256], index: 7, kind: output, shape index: {}]  }
   0x1   :  { %2344 = sst [smem:[#allocation28_spill]] %s2317_s1 }
   0x2   :  { %2345 = sst [smem:[#allocation29_spill]] %s2319_s3 }
   0x3   :  { %2346 = sst [smem:[#allocation30_spill]] %s2320_s4 }
   0x4   :  { %2347 = sst [smem:[#allocation31_spill]] %s2322_s6 }
   0x5   :  { %2348 = sst [smem:[#allocation32_spill]] %s2323_s7 }
   0x6   :  { %12 = vsyncpa [#allocation4], 0 }
   0x7   :  { %14 = vsyncpa [#allocation4 + $0x1], 0 }
   0x8   :  { %15 = vsyncpa [#allocation7], 0 }
   0x9   :  { %17 = vsyncpa [#allocation7 + $0x1], 0 }
   0xa   :  { %18 = vsyncpa [#allocation10], 0 }
   0xb   :  { %20 = vsyncpa [#allocation10 + $0x1], 0 }
   0xc   :  { %21 = vsyncpa [#allocation5], 0 }
   0xd   :  { %23 = vsyncpa [#allocation5 + $0x1], 0  ;;  %s1745_s24 = smov 0   ;;  %s1747_s25 = smov 0  }
   0xe   :  { %s1749_s26 = smov 0   ;;  %s1751_s27 = smov 0  }
   0xf   :  { %s1753_s28 = smov 0   ;;  %s1755_s29 = smov 0  }
  0x10   :  { %s1757_s30 = smov 0   ;;  %s1759_s8 = smov 0  }
  0x11   :  { %s1761_s9 = smov 0   ;;  %s1763_s10 = smov 0  }
  0x12   :  { %s1765_s11 = smov 0  }
  0x13 LB: > { %2349 = sst [smem:[#allocation17_spill]] %s1643_s25  ;;  %s38_s12 = sadd.s32 1, %s1671_s9  ;;  %s1679_s11 = sphi %s1765_s11, %s29_s11   ;;  %s1675_s10 = sphi %s1763_s10, %s2404_s10   ;;  %s1671_s9 = sphi %s1761_s9, %s2403_s9   ;;  %s1667_s8 = sphi %s1759_s8, %s2402_s8   ;;  %s1663_s30 = sphi %s1757_s30, %s2401_s30   ;;  %s1659_s29 = sphi %s1755_s29, %s2400_s29   ;;  %s1655_s28 = sphi %s1753_s28, %s2406_s28   ;;  %s1651_s27 = sphi %s1751_s27, %s2405_s27   ;;  %s1647_s26 = sphi %s1749_s26, %s2398_s26   ;;  %s1643_s25 = sphi %s1747_s25, %s2397_s25   ;;  %s1639_s24 = sphi %s1745_s24, %s2396_s24  }
  0x14   : > { %2350 = sst [smem:[#allocation18_spill]] %s1647_s26  ;;  %p2328_p0 = scmp.eq.s32.totalorder %s1679_s11, 0 }
  0x15   : > { %2351 = sst [smem:[#allocation19_spill]] %s1659_s29  ;;  %p1802_p1 = scmp.ge.s32.totalorder %s38_s12, 2 }
  0x16   : > { %2352 = sst [smem:[#allocation20_spill]] %s1663_s30  ;;  %s74_s14 = sadd.s32 1, %s1647_s26 }
  0x17   : > { %2353 = sst [smem:[#allocation21_spill]] %s1667_s8  ;;  %p81_p2 = scmp.ne.s32.totalorder %s1647_s26, %s1643_s25 }
  0x18   : > { %2354 = sst [smem:[#allocation22_spill]] %s1671_s9  ;;  %s2408_s12 = smov (%p1802_p1, %s38_s12), 0 }
  0x19   : > { %2355 = sst [smem:[#allocation23_spill]] %s1675_s10  ;;  %p83_p4 = por %p81_p2, %p2328_p0 }
  0x1a   : > { %s2356_s13 = scalar_select %p1802_p1, 1, 0 }
  0x1b   : > { %2357 = sst [smem:[#allocation24_spill]] %s2408_s12  ;;  %s71_s15 = ssub.s32 %s1671_s9, %s2408_s12 }
  0x1c   : > { %p2327_p5 = scmp.lt.s32.totalorder %s1679_s11, 4  ;;  %p72_p6 = scmp.eq.s32.totalorder %s71_s15, 0 }
  0x1d   : > { %s2329_s16 = sand.u32 1, %s1679_s11   ;;  %s2326_s17 = sand.u32 1, %s1647_s26  }
  0x1e   : > { %s1823_s18 = scalar_select %p72_p6, %s1647_s26, %s74_s14  }
  0x1f   : > { %s1201_s19 = sshll.u32 %s2326_s17, 4  ;;  %s1236_s20 = sshll.u32 %s1671_s9, 8 }
  0x20   : > { %2358 = sst [smem:[#allocation25_spill]] %s1823_s18  ;;  %s2359_s1 = sld [smem:[#allocation28_spill]] }
  0x21   : > { %s288_s7 = scalar_lea.vmem [#allocation6], %s1201_s19  ;;  %p1835_p7 = pnand %p2327_p5, %p83_p4 }
  0x22   : > { %s296_s12 = sshll.u32 %s288_s7, 4  ;;  %s1845_s14 = scalar_lea.sflag [#allocation7], %s2329_s16  ;;  %s1839_s12 = int_to_ptr.vmem [resolvable:$true] %s296_s12 }
  0x23   : > { %s2360_s15 = scalar_select %p1835_p7, 1, 0 }
  0x24   : > { %p1851_p11 = pneg %p1835_p7 }
  0x26   : > { %s1831_s23 = scalar_lea.hbm %s2359_s1, %s1236_s20  ;;  %s1404_s22 = scalar_lea.hbm %s2359_s1, 512 }
  0x27   : > { %s1399_s20 = scalar_lea.hbm %s1831_s23, 256  ;;  %p1405_p2 = scmp.lt.u32.totalorder %s1831_s23, %s2359_s1 }
  0x28   : > { %p1400_p10 = scmp.ne.s32.totalorder %s1831_s23, %s1399_s20  ;;  %p1406_p4 = scmp.lt.u32.totalorder %s1404_s22, %s1399_s20 }
  0x29   : > { %p1408_p5 = scmp.lt.u32.totalorder %s1399_s20, %s1831_s23 }
  0x2a   : > { %p1402_p12 = pnand %p1851_p11, %p1400_p10  ;;  %p1407_p6 = por %p1406_p4, %p1405_p2 }
  0x2c   : > { %p1403_p13 = pneg %p1402_p12  ;;  %p1409_p3 = por %p1408_p5, %p1407_p6 }
  0x2e   : > { %p1410_p0 = pnand %p1409_p3, %p1403_p13 }
  0x30   : > { %1413 = shalt.err (!%p1410_p0)
}
  0x31   : > { %s1414_s16 = scalar_lea.vmem %s1839_s12, 256  ;;  %s1681_s7 = smov [#allocation6]  }
  0x32   : > { %p1415_p10 = scmp.ne.s32.totalorder %s1839_s12, %s1414_s16  ;;  %s1419_s21 = sshll.u32 %s1681_s7, 4  ;;  %s1420_s21 = int_to_ptr.vmem [resolvable:$false] %s1419_s21 }
  0x33   : > { %s1421_s17 = scalar_lea.vmem %s1420_s21, 512  ;;  %p1422_p9 = scmp.lt.s32.totalorder %s1839_s12, %s1420_s21 }
  0x34   : > { %p1417_p12 = pnand %p1415_p10, %p1851_p11  ;;  %p1423_p1 = scmp.lt.s32.totalorder %s1421_s17, %s1414_s16 }
  0x36   : > { %p1418_p8 = pneg %p1417_p12  ;;  %p1424_p2 = por %p1423_p1, %p1422_p9 }
  0x38   : > { %p1425_p4 = pnand %p1424_p2, %p1418_p8 }
  0x3a   : > { %1428 = shalt.err (!%p1425_p4)
}
  0x3b   : > { %1256 = dma.hbm_to_vmem [thread:$0]  (!%p1835_p7), %s1831_s23, 256, %s1839_s12, %s1845_s14  }
  0x3c   : > { %p2362_p0 = scmp.lt.s32.totalorder %s1679_s11, 5  ;;  %p2363_p3 = scmp.ge.s32.totalorder %s1679_s11, 1 }
  0x3d   : > { %s2365_s16 = sand.u32 1, %s1647_s26   ;;  %s1888_s22 = sshll.u32 %s1671_s9, 7 }
  0x3e   : > { %p1879_p5 = pnand %p2363_p3, %p2362_p0  ;;  %s1885_s20 = sshll.u32 %s2365_s16, 3 }
  0x3f   : > { %s2366_s4 = sld [smem:[#allocation30_spill]]  ;;  %s332_s12 = scalar_lea.vmem [#allocation9], %s1885_s20 }
  0x40   : > { %s2364_s18 = scalar_select %p1879_p5, 1, 0 }
  0x41   : > { %s339_s23 = sshll.u32 %s332_s12, 4  ;;  %s2367_s1 = sand.u32 1, %s1679_s11   ;;  %s340_s23 = int_to_ptr.vmem [resolvable:$true] %s339_s23 }
  0x42   : > { %s1899_s26 = scalar_lea.sflag [#allocation10], %s2367_s1 }
  0x45   : > { %s1894_s17 = scalar_lea.hbm %s2366_s4, %s1888_s22  ;;  %s1434_s7 = scalar_lea.hbm %s2366_s4, 256 }
  0x46   : > { %s1429_s16 = scalar_lea.hbm %s1894_s17, 128  ;;  %p1435_p13 = scmp.lt.u32.totalorder %s1894_s17, %s2366_s4 }
  0x47   : > { %p1430_p1 = scmp.ne.s32.totalorder %s1894_s17, %s1429_s16  ;;  %p1436_p6 = scmp.lt.u32.totalorder %s1434_s7, %s1429_s16 }
  0x48   : > { %p1438_p12 = scmp.lt.u32.totalorder %s1429_s16, %s1894_s17 }
  0x49   : > { %p1432_p8 = pnand %p1430_p1, %p1851_p11  ;;  %p1437_p10 = por %p1436_p6, %p1435_p13 }
  0x4b   : > { %p1433_p9 = pneg %p1432_p8  ;;  %p1439_p2 = por %p1438_p12, %p1437_p10 }
  0x4d   : > { %p1440_p4 = pnand %p1439_p2, %p1433_p9 }
  0x4f   : > { %1443 = shalt.err (!%p1440_p4)
}
  0x50   : > { %s1444_s1 = scalar_lea.vmem %s340_s23, 128  ;;  %s1682_s12 = smov [#allocation9]  }
  0x51   : > { %p1445_p0 = scmp.ne.s32.totalorder %s340_s23, %s1444_s1  ;;  %s1449_s3 = sshll.u32 %s1682_s12, 4  ;;  %s1450_s3 = int_to_ptr.vmem [resolvable:$false] %s1449_s3 }
  0x52   : > { %s1451_s8 = scalar_lea.vmem %s1450_s3, 256  ;;  %p1452_p8 = scmp.lt.s32.totalorder %s340_s23, %s1450_s3 }
  0x53   : > { %p1447_p3 = pnand %p1445_p0, %p1851_p11  ;;  %p1453_p5 = scmp.lt.s32.totalorder %s1451_s8, %s1444_s1 }
  0x55   : > { %p1448_p1 = pneg %p1447_p3  ;;  %p1454_p7 = por %p1453_p5, %p1452_p8 }
  0x57   : > { %p1455_p6 = pnand %p1454_p7, %p1448_p1 }
  0x59   : > { %1458 = shalt.err (!%p1455_p6)
}
  0x5a   : > { %p2368_p13 = scmp.ne.s32.totalorder %s2360_s15, 0  ;;  %s1920_s3 = sadd.s32 4294967295, %s1679_s11  }
  0x5b   : > { %s1195_s6 = sadd.s32 4294967294, %s1679_s11   ;;  %s41_s9 = sadd.s32 1, %s1675_s10 }
  0x5c   : > { %1262 = dma.hbm_to_vmem [thread:$0]  (!%p2368_p13), %s1894_s17, 128, %s340_s23, %s1899_s26  }
  0x5d   : > { %s48_s16 = sadd.s32 1, %s1659_s29  ;;  %p2369_p7 = scmp.ne.s32.totalorder %s2356_s13, 0 }
  0x5e   : > { %p55_p5 = scmp.ne.s32.totalorder %s1659_s29, %s1655_s28  ;;  %p61_p9 = scmp.ne.s32.totalorder %s1655_s28, %s1651_s27 }
  0x5f   : > { %s2410_s9 = smov (!%p2369_p7, %s41_s9), %s1675_s10  ;;  %p62_p12 = scmp.eq.s32.totalorder %s1920_s3, 0 }
  0x60   : > { %p43_p10 = scmp.ge.s32.totalorder %s2410_s9, 2  ;;  %p2370_p2 = scmp.eq.s32.totalorder %s1679_s11, 0 }
  0x61   : > { %p236_p0 = scmp.eq.s32.totalorder %s1920_s3, 3  ;;  %p1945_p3 = por %p62_p12, %p61_p9 }
  0x62   : > { %p1935_p4 = por %p2370_p2, %p55_p5  ;;  %s2412_s9 = smov (%p43_p10, %s2410_s9), 0 }
  0x63   : > { %2372 = sst [smem:[#allocation26_spill]] %s2412_s9  ;;  %p2374_p1 = scmp.ne.s32.totalorder %s1643_s25, %s1639_s24 }
  0x64   : > { %s2373_s13 = scalar_select %p1945_p3, 1, 0 }
  0x65   : > { %p1952_p8 = por %p2374_p1, %p62_p12  ;;  %s45_s7 = ssub.s32 %s1675_s10, %s2412_s9 }
  0x66   : > { %p1958_p6 = por %p236_p0, %p55_p5  ;;  %p46_p7 = scmp.eq.s32.totalorder %s45_s7, 0 }
  0x67   : > { %s2375_s23 = scalar_select %p1952_p8, 1, 0 }
  0x68   : > { %s2376_s21 = scalar_select %p1958_p6, 1, 0 }
  0x69   : > { %p242_p2 = scmp.eq.s32.totalorder %s1195_s6, 3  ;;  %s265_s1 = sand.u32 1, %s1659_s29  }
  0x6a   : > { %s1235_s12 = sshll.u32 %s1675_s10, 8  ;;  %s1198_s24 = sshll.u32 %s265_s1, 4 }
  0x6b   : > { %s1965_s8 = scalar_select %p46_p7, %s1659_s29, %s48_s16  }
  0x6c   : > { %p1970_p10 = por %p242_p2, %p61_p9  ;;  %s1977_s9 = scalar_lea.hbm %s2316_s0, %s1235_s12 }
  0x6d   : > { %2377 = sst [smem:[#allocation27_spill]] %s1965_s8  ;;  %p2379_p5 = scmp.lt.s32.totalorder %s1679_s11, 4 }
  0x6e   : > { %s2378_s4 = scalar_select %p1970_p10, 1, 0 }
  0x6f   : > { %p1983_p12 = pnand %p2379_p5, %p1935_p4  ;;  %s269_s16 = scalar_lea.vmem [#allocation3], %s1198_s24 }
  0x70   : > { %s277_s7 = sshll.u32 %s269_s16, 4  ;;  %s266_s10 = scalar_lea.sflag [#allocation4], %s265_s1  ;;  %s1987_s7 = int_to_ptr.vmem [resolvable:$true] %s277_s7 }
  0x71   : > { %s1459_s25 = scalar_lea.hbm %s1977_s9, 256  ;;  %p1461_p0 = pneg %p1983_p12 }
  0x72   : > { %p1460_p9 = scmp.ne.s32.totalorder %s1977_s9, %s1459_s25  ;;  %s1464_s12 = scalar_lea.hbm %s2316_s0, 512 }
  0x73   : > { %p1465_p4 = scmp.lt.u32.totalorder %s1977_s9, %s2316_s0  ;;  %p1466_p2 = scmp.lt.u32.totalorder %s1464_s12, %s1459_s25 }
  0x74   : > { %p1462_p1 = pnand %p1461_p0, %p1460_p9  ;;  %p1468_p10 = scmp.lt.u32.totalorder %s1459_s25, %s1977_s9 }
  0x75   : > { %p1467_p5 = por %p1466_p2, %p1465_p4 }
  0x76   : > { %p1463_p7 = pneg %p1462_p1 }
  0x77   : > { %p1469_p6 = por %p1468_p10, %p1467_p5 }
  0x79   : > { %p1470_p8 = pnand %p1469_p6, %p1463_p7 }
  0x7b   : > { %1473 = shalt.err (!%p1470_p8)
}
  0x7c   : > { %s1474_s1 = scalar_lea.vmem %s1987_s7, 256  ;;  %s1683_s24 = smov [#allocation3]  }
  0x7d   : > { %p1475_p9 = scmp.ne.s32.totalorder %s1987_s7, %s1474_s1  ;;  %s1479_s16 = sshll.u32 %s1683_s24, 4  ;;  %s1480_s16 = int_to_ptr.vmem [resolvable:$false] %s1479_s16 }
  0x7e   : > { %s1481_s29 = scalar_lea.vmem %s1480_s16, 512  ;;  %p1482_p13 = scmp.lt.s32.totalorder %s1987_s7, %s1480_s16 }
  0x7f   : > { %p1477_p1 = pnand %p1475_p9, %p1461_p0  ;;  %p1483_p4 = scmp.lt.s32.totalorder %s1481_s29, %s1474_s1 }
  0x81   : > { %p1478_p3 = pneg %p1477_p1  ;;  %p1484_p2 = por %p1483_p4, %p1482_p13 }
  0x83   : > { %p1485_p10 = pnand %p1484_p2, %p1478_p3 }
  0x85   : > { %1488 = shalt.err (!%p1485_p10)
}
  0x86   : > { %1253 = dma.hbm_to_vmem [thread:$0]  (!%p1983_p12), %s1977_s9, 256, %s1987_s7, %s266_s10  }
  0x87   : > { %s2018_s30 = scalar_lea.hbm %s2318_s2, %s1888_s22  ;;  %s307_s17 = scalar_lea.vmem [#allocation8], %s1885_s20 }
  0x88   : > { %s314_s12 = sshll.u32 %s307_s17, 4  ;;  %s1489_s1 = scalar_lea.hbm %s2018_s30, 128  ;;  %s315_s12 = int_to_ptr.vmem [resolvable:$true] %s314_s12 }
  0x89   : > { %p1490_p13 = scmp.ne.s32.totalorder %s2018_s30, %s1489_s1  ;;  %s1494_s10 = scalar_lea.hbm %s2318_s2, 256 }
  0x8a   : > { %p1495_p6 = scmp.lt.u32.totalorder %s2018_s30, %s2318_s2  ;;  %p1496_p12 = scmp.lt.u32.totalorder %s1494_s10, %s1489_s1 }
  0x8b   : > { %p1492_p3 = pnand %p1490_p13, %p1851_p11  ;;  %p1498_p7 = scmp.lt.u32.totalorder %s1489_s1, %s2018_s30 }
  0x8c   : > { %p1497_p0 = por %p1496_p12, %p1495_p6 }
  0x8d   : > { %p1493_p8 = pneg %p1492_p3 }
  0x8e   : > { %p1499_p5 = por %p1498_p7, %p1497_p0 }
  0x90   : > { %p1500_p9 = pnand %p1499_p5, %p1493_p8 }
  0x92   : > { %1503 = shalt.err (!%p1500_p9)
}
  0x93   : > { %s1504_s16 = scalar_lea.vmem %s315_s12, 128  ;;  %s1684_s29 = smov [#allocation8]  }
  0x94   : > { %p1505_p1 = scmp.ne.s32.totalorder %s315_s12, %s1504_s16  ;;  %s1509_s8 = sshll.u32 %s1684_s29, 4  ;;  %s1510_s8 = int_to_ptr.vmem [resolvable:$false] %s1509_s8 }
  0x95   : > { %s1511_s25 = scalar_lea.vmem %s1510_s8, 256  ;;  %p1512_p10 = scmp.lt.s32.totalorder %s315_s12, %s1510_s8 }
  0x96   : > { %p1507_p4 = pnand %p1505_p1, %p1851_p11  ;;  %p1513_p13 = scmp.lt.s32.totalorder %s1511_s25, %s1504_s16 }
  0x98   : > { %p1508_p2 = pneg %p1507_p4  ;;  %p1514_p3 = por %p1513_p13, %p1512_p10 }
  0x9a   : > { %p1515_p6 = pnand %p1514_p3, %p1508_p2 }
  0x9c   : > { %1518 = shalt.err (!%p1515_p6)
}
  0x9d   : > { %p2381_p12 = scmp.ne.s32.totalorder %s2360_s15, 0  ;;  %s2043_s6 = scalar_lea.hbm %s2321_s5, %s1888_s22 }
  0x9e   : > { %s350_s24 = scalar_lea.vmem [#allocation11], %s1885_s20  ;;  %s1519_s9 = scalar_lea.hbm %s2043_s6, 128 }
  0x9f   : > { %1259 = dma.hbm_to_vmem [thread:$0]  (!%p2381_p12), %s2018_s30, 128, %s315_s12, %s1845_s14  }
  0xa0   : > { %s357_s10 = sshll.u32 %s350_s24, 4  ;;  %p1520_p8 = scmp.ne.s32.totalorder %s2043_s6, %s1519_s9  ;;  %s358_s10 = int_to_ptr.vmem [resolvable:$true] %s357_s10 }
  0xa1   : > { %s1524_s14 = scalar_lea.hbm %s2321_s5, 256  ;;  %p1525_p5 = scmp.lt.u32.totalorder %s2043_s6, %s2321_s5 }
  0xa2   : > { %p1522_p0 = pnand %p1520_p8, %p1851_p11  ;;  %p1526_p9 = scmp.lt.u32.totalorder %s1524_s14, %s1519_s9 }
  0xa3   : > { %p1528_p4 = scmp.lt.u32.totalorder %s1519_s9, %s2043_s6 }
  0xa4   : > { %p1523_p7 = pneg %p1522_p0  ;;  %p1527_p1 = por %p1526_p9, %p1525_p5 }
  0xa6   : > { %p1529_p2 = por %p1528_p4, %p1527_p1 }
  0xa8   : > { %p1530_p10 = pnand %p1529_p2, %p1523_p7 }
  0xaa   : > { %1533 = shalt.err (!%p1530_p10)
}
  0xab   : > { %s1534_s20 = scalar_lea.vmem %s358_s10, 128  ;;  %s1685_s22 = smov [#allocation11]  }
  0xac   : > { %p1535_p13 = scmp.ne.s32.totalorder %s358_s10, %s1534_s20  ;;  %s1539_s29 = sshll.u32 %s1685_s22, 4  ;;  %s1540_s29 = int_to_ptr.vmem [resolvable:$false] %s1539_s29 }
  0xad   : > { %s1541_s8 = scalar_lea.vmem %s1540_s29, 256  ;;  %p1542_p8 = scmp.lt.s32.totalorder %s358_s10, %s1540_s29 }
  0xae   : > { %p1537_p3 = pnand %p1535_p13, %p1851_p11  ;;  %p1543_p0 = scmp.lt.s32.totalorder %s1541_s8, %s1534_s20 }
  0xb0   : > { %p1538_p6 = pneg %p1537_p3  ;;  %p1544_p12 = por %p1543_p0, %p1542_p8 }
  0xb2   : > { %p1545_p5 = pnand %p1544_p12, %p1538_p6 }
  0xb4   : > { %1548 = shalt.err (!%p1545_p5)
}
  0xb5   : > { %p2382_p9 = scmp.ne.s32.totalorder %s2360_s15, 0  ;;  %p2383_p7 = scmp.ne.s32.totalorder %s2364_s18, 0 }
  0xb6   : > { %s2067_s19 = sand.u32 (!%p2383_p7), 1, %s1655_s28   ;;  %p2384_p11 = scmp.ne.s32.totalorder (!%p2383_p7), %s2373_s13, 0 }
  0xb7   : > { %1265 = dma.hbm_to_vmem [thread:$0]  (!%p2382_p9), %s2043_s6, 128, %s358_s10, %s1899_s26  }
  0xb8   : > { %366 = sbr.rel (%p2383_p7) target bundleno = 1057 (0x421), region = 48  ;;  %s1211_s25 = sshll.u32 (!%p2383_p7), %s2067_s19, 4 }
  0xb9   : > { %s369_s17 = scalar_lea.sflag (!%p2383_p7), [#allocation4], %s2067_s19  ;;  %s372_s1 = scalar_lea.vmem (!%p2383_p7), [#allocation3], %s1211_s25 }
  0xbf   : > { %1622 = dma.done.wait (%p2384_p11), %s369_s17, 256  }
  0xc0   : > { %1624 = vsyncadd (%p2384_p11), %s369_s17, 4294967040  ;;  %s2385_s15 = sld [smem:[#allocation17_spill]]  ;;  %s377_s26 = sand.u32 1, %s1920_s3  }
  0xc1   : > { %s378_s24 = scalar_lea.sflag [#allocation7], %s377_s26  ;;  %p2386_p12 = scmp.ne.s32.totalorder %s2375_s23, 0 }
  0xc6   : > { %s379_s18 = sand.u32 1, %s2385_s15  }
  0xc7   : > { %s2077_s6 = sshll.u32 %s379_s18, 4 }
  0xc8   : > { %s381_s10 = scalar_lea.vmem [#allocation6], %s2077_s6 }
  0xc9   : > { %1626 = dma.done.wait (%p2386_p12), %s378_s24, 384  }
  0xca   : > { %1628 = vsyncadd (%p2386_p12), %s378_s24, 4294966912  ;;  %s2084_s9 = sshll.u32 %s379_s18, 3  ;;  %s396_s7 = scalar_lea.sflag [#allocation10], %s377_s26 }
  0xcb   : > { %s390_s13 = scalar_lea.vmem [#allocation8], %s2084_s9  ;;  %s399_s16 = scalar_lea.vmem [#allocation9], %s2084_s9 }
  0xcc   : > { %1630 = dma.done.wait (%p2386_p12), %s396_s7, 256  }
  0xcd   : > { %1632 = vsyncadd (%p2386_p12), %s396_s7, 4294967040  ;;  %s2387_s3 = sld [smem:[#allocation20_spill]]  ;;  %s2388_s22 = sld [smem:[#allocation29_spill]] }
  0xce   : > { %s408_s8 = scalar_lea.vmem [#allocation11], %s2084_s9  ;;  %s2098_s17 = scalar_lea.vmem [#allocation12], %s1211_s25 }
  0xd3   : > { %p463_p1 = scmp.lt.s32.totalorder %s2387_s3, 1  ;;  %p1218_p4 = scmp.ne.s32.totalorder %s2387_s3, 0 }
  0xd4   : > { %v471_v0 = vld [vmem:[%s372_s1] sm:$0xff] (!%p1218_p4)  ;;  %v472_v1 = vld [vmem:[%s372_s1 + $0x8] sm:$0xff] (!%p1218_p4) }
  0xd5   : > { %s464_s14 = scalar_select %p463_p1, %s2387_s3, 1 }
  0xd6   : > { %470 = sbr.rel (%p1218_p4) target bundleno = 221 (0xdd), region = 72  ;;  %473 = vst [vmem:[#allocation2] sm:$0xff] (!%p1218_p4), %v471_v0  ;;  %474 = vst [vmem:[#allocation2 + $0x8] sm:$0xff] (!%p1218_p4), %v472_v1 }
  0xd7   : > { %s1217_s30 = sshll.u32 %s464_s14, 3 }
  0xd8   : > { %s466_s29 = scalar_lea.vmem %s2388_s22, %s1217_s30 }
  0xdd PF: > { %v477_v2 = vld [vmem:[%s466_s29] sm:$0xff]  ;;  %v1686_v3 = vmov 0   ;;  %v1687_v4 = vmov 1   ;;  %v1688_v5 = vmov 0.0   ;;  %v1689_v7 = vmov 2   ;;  %v2110_v11 = vld [vmem:[#allocation2 + $0x8] sm:$0xff] }
  0xde   : > { %1378 = vset.pattern.permute.xlu0 %v1686_v3  ;;  %603 = vmatprep.mubr.f32.mxu0 %v1688_v5  ;;  %v2101_v6 = vld [vmem:[%s399_s16] sm:$0xff]  ;;  %v1690_v8 = vmov 3   ;;  %v1691_v9 = vmov 4   ;;  %v484_v13 = vrot.slane %v2110_v11, 4  ;;  %v534_v56 = vld [vmem:[%s390_s13] sm:$0xff]  ;;  %vm535_vm0 = vcmask 64512  }
  0xdf   : > { %519 = vperm.xlu0 %1378, %v477_v2   ;;  %981 = vmatprep.mubr.f32.mxu1 %v1688_v5  ;;  %v2108_v10 = vld [vmem:[#allocation2] sm:$0xff]  ;;  %v1692_v57 = vmov 5   ;;  %v1693_v58 = vmov 6   ;;  %v1694_v59 = vmov 7   ;;  %v531_v61 = vld [vmem:[%s381_s10 + $0x8] sm:$0xff]  ;;  %s1695_s23 = smov 16  }
  0xe0   : > { %1380 = vset.pattern.permute.xlu1 %v1689_v7  ;;  %v478_v12 = vrot.slane %v2108_v10, 4  ;;  %v485_v15 = vadd.f32 %v484_v13, %v2110_v11  ;;  %v530_v60 = vld [vmem:[%s381_s10] sm:$0xff]  ;;  %s1696_s25 = smov 17   ;;  %s1697_s1 = smov 15  }
  0xe1   : > { %651 = vperm.xlu1 %1380, %v477_v2   ;;  %s1698_s15 = smov 1   ;;  %s1700_s26 = smov 127  }
  0xe2   : > { %v479_v14 = vadd.f32 %v478_v12, %v2108_v10  ;;  %v486_v17 = vrot.slane %v485_v15, 2  ;;  %s1701_s18 = smov 113   ;;  %s1702_s6 = smov 111  }
  0xe3   : > { %1379 = vset.pattern.permute.xlu0 %v1687_v4  ;;  %s1703_s24 = smov 112   ;;  %s2389_s7 = sld [smem:[#allocation31_spill]] }
  0xe4   : > { %525 = vperm.xlu0 %1379, %v477_v2   ;;  %v480_v16 = vrot.slane %v479_v14, 2  ;;  %v487_v19 = vadd.f32 %v486_v17, %v485_v15 }
  0xe5   : > { %1381 = vset.pattern.permute.xlu1 %v1690_v8 }
  0xe6   : > { %657 = vperm.xlu1 %1381, %v477_v2   ;;  %v481_v18 = vadd.f32 %v480_v16, %v479_v14  ;;  %v488_v21 = vrot.slane %v487_v19, 1 }
  0xe8   : > { %1383 = vset.pattern.permute.xlu0 %v1686_v3  ;;  %v482_v20 = vrot.slane %v481_v18, 1  ;;  %v489_v23 = vadd.f32 %v488_v21, %v487_v19 }
  0xe9   : > { %694 = vperm.xlu0 %1383, %v2101_v6  }
  0xea   : > { %1382 = vset.pattern.permute.xlu1 %v1691_v9  ;;  %v483_v22 = vadd.f32 %v482_v20, %v481_v18  ;;  %v492_v25 = vmul.f32 0.125, %v489_v23 }
  0xeb   : > { %665 = vperm.xlu1 %1382, %v2101_v6  }
  0xec   : > { %v491_v24 = vmul.f32 0.125, %v483_v22  ;;  %v494_v27 = vsub.f32 %v2110_v11, %v492_v25 }
  0xed   : > { %1386 = vset.pattern.permute.xlu0 %v1690_v8 }
  0xee   : > { %784 = vperm.xlu0 %1386, %v2101_v6   ;;  %v493_v26 = vsub.f32 %v2108_v10, %v491_v24  ;;  %v496_v29 = vmul.f32 %v494_v27, %v494_v27 }
  0xef   : > { %1384 = vset.pattern.permute.xlu1 %v1687_v4 }
  0xf0   : > { %724 = vperm.xlu1 %1384, %v2101_v6   ;;  %v495_v28 = vmul.f32 %v493_v26, %v493_v26  ;;  %v503_v31 = vrot.slane %v496_v29, 4 }
  0xf2   : > { %v497_v30 = vrot.slane %v495_v28, 4  ;;  %v504_v33 = vadd.f32 %v503_v31, %v496_v29  ;;  %1387 = vset.pattern.permute.xlu0 %v1692_v57 }
  0xf3   : > { %814 = vperm.xlu0 %1387, %v2101_v6  }
  0xf4   : > { %1385 = vset.pattern.permute.xlu1 %v1689_v7  ;;  %v498_v32 = vadd.f32 %v497_v30, %v495_v28  ;;  %v505_v35 = vrot.slane %v504_v33, 2 }
  0xf5   : > { %754 = vperm.xlu1 %1385, %v2101_v6  }
  0xf6   : > { %v499_v34 = vrot.slane %v498_v32, 2  ;;  %v506_v37 = vadd.f32 %v505_v35, %v504_v33 }
  0xf7   : > { %1388 = vset.pattern.permute.xlu0 %v1693_v58 }
  0xf8   : > { %v500_v36 = vadd.f32 %v499_v34, %v498_v32  ;;  %v507_v39 = vrot.slane %v506_v37, 1  ;;  %844 = vperm.xlu0 %1388, %v2101_v6  }
  0xfa   : > { %v501_v38 = vrot.slane %v500_v36, 1  ;;  %v508_v41 = vadd.f32 %v507_v39, %v506_v37 }
  0xfc   : > { %v502_v40 = vadd.f32 %v501_v38, %v500_v36  ;;  %v510_v43 = vmul.f32 0.125, %v508_v41  ;;  %1389 = vset.pattern.permute.xlu0 %v1694_v59 }
  0xfe   : > { %v509_v42 = vmul.f32 0.125, %v502_v40  ;;  %v512_v45 = vadd.f32 1e-06, %v510_v43 }
 0x100   : > { %v511_v44 = vadd.f32 1e-06, %v509_v42 }
 0x102   : > { %1391 = vrsqrt.f32 %v511_v44 }
 0x103   : > { %1393 = vrsqrt.f32 %v512_v45 }
 0x10c   : > { %v1392_v46 = vpop.eup %1391 }
 0x10d   : > { %v1394_v47 = vpop.eup %1393  ;;  %v515_v49 = vmul.f32 %v1392_v46, %v493_v26 }
 0x10e   : > { %v516_v50 = vmul.f32 %v1394_v47, %v494_v27 }
 0x15e   : > { %v520_v48 = vpop.permute.xlu0 %519 }
 0x15f   : > { %v522_v51 = vmul.f32 %v520_v48, %v515_v49  ;;  %v523_v52 = vmul.f32 %v520_v48, %v516_v50 }
 0x160   : > { %v652_v41 = vpop.permute.xlu1 %651 }
 0x163   : > { %v526_v53 = vpop.permute.xlu0 %525 }
 0x164   : > { %v529_v54 = vadd.f32 %v526_v53, %v523_v52  ;;  %v528_v55 = vadd.f32 %v526_v53, %v522_v51  ;;  %v1699_v51 = vmov 8  }
 0x165   : > { %v658_v47 = vpop.permute.xlu1 %657 }
 0x166   : > { %539 = vmatprep.subr.mxu0 %v529_v54  ;;  %v532_v62 = vmul.f32 %v530_v60, %v528_v55  ;;  %v533_v0 = vmul.f32 %v531_v61, %v529_v54 }
 0x167   : > { %540 = vmatpush1.msra.mxu0 %v528_v55 }
 0x168   : > { %1219 = vmatmul.mubr.msk.f32.vlgmr.msra.gmra.mrb[0].mxu0 %vm535_vm0, %v534_v56  ;;  %v695_v53 = vpop.permute.xlu0 %694 }
 0x16d   : > { %v2151_v55 = vpop.permute.xlu0 %784 }
 0x172   : > { %v2153_v58 = vpop.permute.xlu0 %814 }
 0x177   : > { %v2155_v60 = vpop.permute.xlu0 %844 }
 0x23b   : > { %v605_v63 = vpop.f32.mrb[0].mxu0 }
 0x23c   : > { %v610_v1 = vadd.f32 %v605_v63, %v532_v62  ;;  %v607_v2 = vpop.f32.mrb[1].mxu0  ;;  %v674_v62 = vlaneseq }
 0x23d   : > { %v611_v3 = vadd.f32 %v607_v2, %v533_v0 }
 0x23e   : > { %v612_v4 = vrot.slane %v610_v1, 4  ;;  %v2159_v2 = vand.u32 127, %v674_v62 }
 0x23f   : > { %v618_v5 = vrot.slane %v611_v3, 4 }
 0x240   : > { %v613_v7 = vadd.f32 %v612_v4, %v610_v1  ;;  %vm676_vm1 = vcmp.lt.s32.totalorder %v2159_v2, 17  ;;  %vm705_vm2 = vcmp.lt.s32.totalorder %v2159_v2, 16  ;;  %vm735_vm3 = vcmp.lt.s32.totalorder %v2159_v2, 15 }
 0x241   : > { %v619_v8 = vadd.f32 %v618_v5, %v611_v3  ;;  %vm765_vm4 = vcmp.lt.s32.totalorder %v2159_v2, 1  ;;  %vm795_vm5 = vcmp.lt.s32.totalorder %v2159_v2, 127  ;;  %vm825_vm6 = vcmp.lt.s32.totalorder %v2159_v2, 113 }
 0x242   : > { %v614_v9 = vrot.slane %v613_v7, 2  ;;  %vm855_vm7 = vcmp.lt.s32.totalorder %v2159_v2, 112  ;;  %vm885_vm8 = vcmp.lt.s32.totalorder %v2159_v2, 111 }
 0x243   : > { %v620_v12 = vrot.slane %v619_v8, 2 }
 0x244   : > { %v615_v13 = vadd.f32 %v614_v9, %v613_v7  ;;  %v679_v7 = vld [vmem:[%s2389_s7] ss:$8 sm:$0x3] }
 0x245   : > { %v621_v14 = vadd.f32 %v620_v12, %v619_v8  ;;  %v1220_v12 = vld [vmem:[%s2389_s7 + $0x1] ss:$8 sm:$0x3] }
 0x246   : > { %v616_v15 = vrot.slane %v615_v13, 1 }
 0x247   : > { %v622_v16 = vrot.slane %v621_v14, 1 }
 0x248   : > { %v617_v17 = vadd.f32 %v616_v15, %v615_v13 }
 0x249   : > { %v623_v18 = vadd.f32 %v622_v16, %v621_v14 }
 0x24a   : > { %v624_v19 = vmul.f32 0.125, %v617_v17 }
 0x24b   : > { %v625_v20 = vmul.f32 0.125, %v623_v18 }
 0x24c   : > { %v626_v21 = vsub.f32 %v610_v1, %v624_v19  ;;  %v682_v1 = vshrl.u32 %v674_v62, 7  ;;  %v1221_v19 = vld [vmem:[%s2389_s7 + $0x2] ss:$8 sm:$0x3] }
 0x24d   : > { %v627_v22 = vsub.f32 %v611_v3, %v625_v20 }
 0x24e   : > { %v628_v23 = vmul.f32 %v626_v21, %v626_v21  ;;  %v2163_v4 = vsub.s32 0, %v682_v1  ;;  %v2165_v5 = vsub.s32 1, %v682_v1 }
 0x24f   : > { %v629_v24 = vmul.f32 %v627_v22, %v627_v22 }
 0x250   : > { %v630_v25 = vrot.slane %v628_v23, 4  ;;  %v684_v13 = vrot.slane %v679_v7, %v2163_v4  ;;  %v688_v14 = vrot.slane %v679_v7, %v2165_v5  ;;  %v714_v17 = vrot.slane %v1220_v12, %v2163_v4  ;;  %v1225_v7 = vld [vmem:[%s2389_s7 + $0x7] ss:$8 sm:$0x3] }
 0x251   : > { %v636_v26 = vrot.slane %v629_v24, 4  ;;  %v718_v18 = vrot.slane %v1220_v12, %v2165_v5 }
 0x252   : > { %v631_v27 = vadd.f32 %v630_v25, %v628_v23  ;;  %v1222_v25 = vld [vmem:[%s2389_s7 + $0x3] ss:$8 sm:$0x3] }
 0x253   : > { %v637_v28 = vadd.f32 %v636_v26, %v629_v24  ;;  %v744_v26 = vrot.slane %v1221_v19, %v2163_v4 }
 0x254   : > { %v632_v29 = vrot.slane %v631_v27, 2 }
 0x255   : > { %v638_v30 = vrot.slane %v637_v28, 2 }
 0x256   : > { %v633_v31 = vadd.f32 %v632_v29, %v631_v27  ;;  %v748_v27 = vrot.slane %v1221_v19, %v2165_v5 }
 0x257   : > { %v639_v32 = vadd.f32 %v638_v30, %v637_v28 }
 0x258   : > { %v634_v33 = vrot.slane %v633_v31, 1 }
 0x259   : > { %v640_v34 = vrot.slane %v639_v32, 1 }
 0x25a   : > { %v635_v35 = vadd.f32 %v634_v33, %v633_v31  ;;  %v1223_v33 = vld [vmem:[%s2389_s7 + $0x5] ss:$8 sm:$0x3] }
 0x25b   : > { %v641_v36 = vadd.f32 %v640_v34, %v639_v32 }
 0x25c   : > { %v642_v37 = vmul.f32 0.125, %v635_v35  ;;  %v774_v35 = vrot.slane %v1222_v25, %v2163_v4 }
 0x25d   : > { %v643_v38 = vmul.f32 0.125, %v641_v36  ;;  %v778_v36 = vrot.slane %v1222_v25, %v2165_v5 }
 0x25e   : > { %v644_v39 = vadd.f32 1e-06, %v642_v37 }
 0x25f   : > { %v645_v40 = vadd.f32 1e-06, %v643_v38 }
 0x260   : > { %1395 = vrsqrt.f32 %v644_v39 }
 0x261   : > { %1397 = vrsqrt.f32 %v645_v40 }
 0x26a   : > { %v1396_v42 = vpop.eup %1395 }
 0x26b   : > { %v1398_v43 = vpop.eup %1397  ;;  %v648_v44 = vmul.f32 %v1396_v42, %v626_v21 }
 0x26c   : > { %v649_v45 = vmul.f32 %v1398_v43, %v627_v22 }
 0x26d   : > { %v654_v46 = vmul.f32 %v652_v41, %v648_v44  ;;  %v804_v44 = vrot.slane %v1223_v33, %v2163_v4 }
 0x26e   : > { %v655_v48 = vmul.f32 %v652_v41, %v649_v45  ;;  %v1224_v45 = vld [vmem:[%s2389_s7 + $0x6] ss:$8 sm:$0x3] }
 0x26f   : > { %v2127_v49 = vadd.f32 %v658_v47, %v654_v46  ;;  %v834_v62 = vrot.slane %v1224_v45, %v2163_v4 }
 0x270   : > { %v2131_v50 = vadd.f32 %v658_v47, %v655_v48 }
 0x271   : > { %701 = vrot.lane.b32.xlu0 %v2127_v49, %s1695_s23  ;;  %670 = vrot.lane.b32.xlu1 %v2127_v49, %s1696_s25 }
 0x275   : > { %672 = vrot.lane.b32.xlu0 %v2131_v50, %s1696_s25  ;;  %731 = vrot.lane.b32.xlu1 %v2127_v49, %s1697_s1 }
 0x279   : > { %874 = vperm.xlu0 %1389, %v2101_v6   ;;  %761 = vrot.lane.b32.xlu1 %v2127_v49, %s1698_s15 }
 0x27d   : > { %1390 = vset.pattern.permute.xlu0 %v1699_v51  ;;  %791 = vrot.lane.b32.xlu1 %v2127_v49, %s1700_s26 }
 0x27e   : > { %904 = vperm.xlu0 %1390, %v2101_v6   ;;  %v666_v6 = vpop.permute.xlu1 %665 }
 0x27f   : > { %v668_v34 = vmul.f32 %v666_v6, %v2127_v49  ;;  %v669_v41 = vmul.f32 %v666_v6, %v2131_v50 }
 0x281   : > { %821 = vrot.lane.b32.xlu1 %v2127_v49, %s1701_s18 }
 0x282   : > { %881 = vrot.lane.b32.xlu0 %v2127_v49, %s1702_s6  ;;  %v725_v52 = vpop.permute.xlu1 %724 }
 0x285   : > { %851 = vrot.lane.b32.xlu1 %v2127_v49, %s1703_s24  ;;  %v808_v49 = vrot.slane %v1223_v33, %v2165_v5 }
 0x286   : > { %v2149_v54 = vpop.permute.xlu1 %754 }
 0x289   : > { %703 = vrot.lane.b32.xlu1 %v2131_v50, %s1695_s23 }
 0x28d   : > { %733 = vrot.lane.b32.xlu1 %v2131_v50, %s1697_s1 }
 0x291   : > { %763 = vrot.lane.b32.xlu1 %v2131_v50, %s1698_s15 }
 0x295   : > { %793 = vrot.lane.b32.xlu1 %v2131_v50, %s1700_s26 }
 0x299   : > { %823 = vrot.lane.b32.xlu1 %v2131_v50, %s1701_s18 }
 0x29d   : > { %853 = vrot.lane.b32.xlu1 %v2131_v50, %s1703_s24 }
 0x2a1   : > { %883 = vrot.lane.b32.xlu1 %v2131_v50, %s1702_s6  ;;  %s2390_s6 = sld [smem:[#allocation20_spill]] }
 0x2a7   : > { %p1228_p2 = scmp.ge.s32.totalorder %s2390_s6, 1 }
 0x2e3   : > { %v671_v56 = vpop.permute.xlu1 %670  ;;  %v702_v0 = vpop.permute.xlu0 %701 }
 0x2e7   : > { %v732_v57 = vpop.permute.xlu1 %731  ;;  %v673_v8 = vpop.permute.xlu0 %672 }
 0x2e8   : > { %v677_v15 = vsel %vm676_vm1, %v671_v56, %v673_v8  ;;  %v678_v16 = vsel %vm676_vm1, %v673_v8, %v671_v56 }
 0x2e9   : > { %v691_v23 = vmul.f32 %v684_v13, %v678_v16  ;;  %v692_v24 = vmul.f32 %v688_v14, %v677_v15 }
 0x2eb   : > { %v762_v59 = vpop.permute.xlu1 %761  ;;  %v697_v37 = vmul.f32 %v695_v53, %v691_v23  ;;  %v698_v38 = vmul.f32 %v695_v53, %v692_v24 }
 0x2ef   : > { %v792_v61 = vpop.permute.xlu1 %791 }
 0x2f3   : > { %v2157_v63 = vpop.permute.xlu1 %821 }
 0x2f7   : > { %v2161_v3 = vpop.permute.xlu1 %851 }
 0x2f8   : > { %v875_v46 = vpop.permute.xlu0 %874 }
 0x2fb   : > { %v704_v9 = vpop.permute.xlu1 %703 }
 0x2fc   : > { %v706_v21 = vsel %vm705_vm2, %v702_v0, %v704_v9  ;;  %v707_v22 = vsel %vm705_vm2, %v704_v9, %v702_v0  ;;  %v838_v0 = vrot.slane %v1224_v45, %v2165_v5 }
 0x2fd   : > { %v721_v28 = vmul.f32 %v714_v17, %v707_v22  ;;  %v722_v29 = vmul.f32 %v718_v18, %v706_v21  ;;  %v1226_v17 = vld [vmem:[%s2389_s7 + $0x10] ss:$8 sm:$0x3]  ;;  %v905_v18 = vpop.permute.xlu0 %904  ;;  %v864_v21 = vrot.slane %v1225_v7, %v2163_v4  ;;  %v868_v22 = vrot.slane %v1225_v7, %v2165_v5 }
 0x2ff   : > { %v734_v20 = vpop.permute.xlu1 %733  ;;  %v727_v47 = vmul.f32 %v725_v52, %v721_v28  ;;  %v728_v48 = vmul.f32 %v725_v52, %v722_v29 }
 0x300   : > { %v736_v30 = vsel %vm735_vm3, %v732_v57, %v734_v20  ;;  %v737_v31 = vsel %vm735_vm3, %v734_v20, %v732_v57  ;;  %v699_v57 = vadd.f32 %v697_v37, %v668_v34 }
 0x301   : > { %v751_v42 = vmul.f32 %v744_v26, %v737_v31  ;;  %v752_v43 = vmul.f32 %v748_v27, %v736_v30  ;;  %v894_v26 = vrot.slane %v1226_v17, %v2163_v4  ;;  %v898_v27 = vrot.slane %v1226_v17, %v2165_v5 }
 0x302   : > { %v729_v8 = vadd.f32 %v727_v47, %v699_v57 }
 0x303   : > { %v764_v32 = vpop.permute.xlu1 %763  ;;  %v757_v52 = vmul.f32 %v2149_v54, %v751_v42  ;;  %v758_v1 = vmul.f32 %v2149_v54, %v752_v43 }
 0x304   : > { %v766_v39 = vsel %vm765_vm4, %v762_v59, %v764_v32  ;;  %v767_v40 = vsel %vm765_vm4, %v764_v32, %v762_v59  ;;  %v700_v59 = vadd.f32 %v698_v38, %v669_v41 }
 0x305   : > { %v781_v53 = vmul.f32 %v774_v35, %v767_v40  ;;  %v782_v56 = vmul.f32 %v778_v36, %v766_v39  ;;  %v882_v35 = vpop.permute.xlu0 %881 }
 0x306   : > { %v730_v9 = vadd.f32 %v728_v48, %v700_v59 }
 0x307   : > { %v794_v51 = vpop.permute.xlu1 %793  ;;  %v787_v14 = vmul.f32 %v2151_v55, %v781_v53  ;;  %v788_v15 = vmul.f32 %v2151_v55, %v782_v56  ;;  %v759_v55 = vadd.f32 %v757_v52, %v729_v8 }
 0x308   : > { %v796_v50 = vsel %vm795_vm5, %v792_v61, %v794_v51  ;;  %v797_v6 = vsel %vm795_vm5, %v794_v51, %v792_v61  ;;  %v760_v23 = vadd.f32 %v758_v1, %v730_v9 }
 0x309   : > { %v811_v12 = vmul.f32 %v804_v44, %v796_v50  ;;  %v812_v61 = vmul.f32 %v808_v49, %v797_v6  ;;  %v789_v28 = vadd.f32 %v787_v14, %v759_v55 }
 0x30a   : > { %v790_v29 = vadd.f32 %v788_v15, %v760_v23 }
 0x30b   : > { %v824_v13 = vpop.permute.xlu1 %823  ;;  %v817_v24 = vmul.f32 %v2153_v58, %v811_v12  ;;  %v818_v25 = vmul.f32 %v2153_v58, %v812_v61 }
 0x30c   : > { %v826_v16 = vsel %vm825_vm6, %v2157_v63, %v824_v13  ;;  %v827_v54 = vsel %vm825_vm6, %v824_v13, %v2157_v63 }
 0x30d   : > { %v841_v19 = vmul.f32 %v834_v62, %v826_v16  ;;  %v842_v20 = vmul.f32 %v838_v0, %v827_v54  ;;  %v819_v4 = vadd.f32 %v817_v24, %v789_v28  ;;  %v820_v37 = vadd.f32 %v818_v25, %v790_v29 }
 0x30f   : > { %v854_v63 = vpop.permute.xlu1 %853  ;;  %v847_v32 = vmul.f32 %v2155_v60, %v841_v19  ;;  %v848_v33 = vmul.f32 %v2155_v60, %v842_v20 }
 0x310   : > { %v856_v30 = vsel %vm855_vm7, %v2161_v3, %v854_v63  ;;  %v857_v31 = vsel %vm855_vm7, %v854_v63, %v2161_v3 }
 0x311   : > { %v871_v58 = vmul.f32 %v864_v21, %v856_v30  ;;  %v872_v34 = vmul.f32 %v868_v22, %v857_v31  ;;  %v850_v42 = vadd.f32 %v848_v33, %v820_v37  ;;  %v849_v43 = vadd.f32 %v847_v32, %v819_v4 }
 0x313   : > { %v877_v36 = vmul.f32 %v875_v46, %v871_v58  ;;  %v884_v5 = vpop.permute.xlu1 %883  ;;  %v878_v38 = vmul.f32 %v875_v46, %v872_v34  ;;  %v913_v46 = vld [vmem:[%s408_s8] sm:$0xff] }
 0x314   : > { %v886_v39 = vsel %vm885_vm8, %v882_v35, %v884_v5  ;;  %v887_v40 = vsel %vm885_vm8, %v884_v5, %v882_v35 }
 0x315   : > { %v901_v3 = vmul.f32 %v894_v26, %v886_v39  ;;  %v902_v41 = vmul.f32 %v898_v27, %v887_v40  ;;  %v880_v60 = vadd.f32 %v878_v38, %v850_v42  ;;  %v879_v45 = vadd.f32 %v877_v36, %v849_v43 }
 0x317   : > { %v908_v44 = vmul.f32 %v905_v18, %v902_v41  ;;  %v907_v47 = vmul.f32 %v905_v18, %v901_v3 }
 0x319   : > { %v910_v48 = vadd.f32 %v908_v44, %v880_v60  ;;  %v909_v49 = vadd.f32 %v907_v47, %v879_v45 }
 0x31b   : > { %v912_v51 = vmax.f32 %v910_v48, 0.0  ;;  %v911_v53 = vmax.f32 %v909_v49, 0.0 }
 0x31d   : > { %917 = vmatprep.subr.mxu1 %v912_v51 }
 0x31e   : > { %918 = vmatpush1.msra.mxu1 %v911_v53 }
 0x31f   : > { %1227 = vmatmul.mubr.msk.f32.vlgmr.msra.gmra.mrb[0].mxu1 %vm535_vm0, %v913_v46 }
 0x3ee   : > { %991 = sbr.rel (%p1228_p2) target bundleno = 1015 (0x3f7), region = 76 }
 0x3f2   : > { %v983_v2 = vpop.f32.mrb[0].mxu1 }
 0x3f3   : > { %v984_v56 = vadd.f32 %v983_v2, %v2108_v10  ;;  %v985_v50 = vpop.f32.mrb[1].mxu1 }
 0x3f4   : > { %v986_v6 = vadd.f32 %v985_v50, %v2110_v11 }
 0x3f5   : > { %992 = vst [vmem:[#allocation2] sm:$0xff] %v984_v56 }
 0x3f6   : > { %993 = vst [vmem:[#allocation2 + $0x8] sm:$0xff] %v986_v6 }
 0x3f7 PF: > { %s2391_s24 = sld [smem:[#allocation20_spill]] }
 0x3fd   : > { %p1229_p10 = scmp.ne.s32.totalorder %s2391_s24, 1 }
 0x3fe   : > { %998 = vst [vmem:[%s2098_s17] sm:$0xff] (!%p1229_p10), %v984_v56  ;;  %999 = vst [vmem:[%s2098_s17 + $0x8] sm:$0xff] (!%p1229_p10), %v986_v6 }
 0x3ff   : > { %997 = sbr.rel (%p1229_p10) target bundleno = 1030 (0x406), region = 80 }
 0x406 PF: > { %s2392_s9 = sld [smem:[#allocation21_spill]]  ;;  %s2393_s16 = sld [smem:[#allocation32_spill]] }
 0x407   : > { %s1015_s14 = sshll.u32 %s2098_s17, 4  ;;  %s1001_s30 = scalar_lea.sflag [#allocation5], %s2067_s19  ;;  %s1016_s14 = int_to_ptr.vmem [resolvable:$true] %s1015_s14 }
 0x408   : > { %s1549_s12 = scalar_lea.vmem %s1016_s14, 256  ;;  %p2394_p3 = scmp.ne.s32.totalorder %s2376_s21, 0 }
 0x409   : > { %p1550_p13 = scmp.ne.s32.totalorder %s1016_s14, %s1549_s12  ;;  %s1704_s20 = smov [#allocation12]  }
 0x40a   : > { %s1553_s22 = sshll.u32 %s1704_s20, 4  ;;  %s1554_s22 = int_to_ptr.vmem [resolvable:$false] %s1553_s22 }
 0x40b   : > { %p1551_p6 = pnand %p1550_p13, %p2394_p3  ;;  %s1555_s29 = scalar_lea.vmem %s1554_s22, 512 }
 0x40c   : > { %s1237_s8 = sshll.u32 %s2392_s9, 8  ;;  %p1556_p0 = scmp.lt.s32.totalorder %s1016_s14, %s1554_s22 }
 0x40d   : > { %s2258_s3 = scalar_lea.hbm %s2393_s16, %s1237_s8  ;;  %p1552_p8 = pneg %p1551_p6 }
 0x40e   : > { %p1557_p5 = scmp.lt.s32.totalorder %s1555_s29, %s1549_s12 }
 0x410   : > { %p1558_p9 = por %p1557_p5, %p1556_p0 }
 0x412   : > { %p1559_p7 = pnand %p1558_p9, %p1552_p8 }
 0x414   : > { %1562 = shalt.err (!%p1559_p7)
}
 0x415   : > { %s1563_s19 = scalar_lea.hbm %s2258_s3, 256  ;;  %s1567_s25 = scalar_lea.hbm %s2393_s16, 512 }
 0x416   : > { %p1564_p11 = scmp.ne.s32.totalorder %s2258_s3, %s1563_s19  ;;  %p1568_p4 = scmp.lt.u32.totalorder %s2258_s3, %s2393_s16 }
 0x417   : > { %p1569_p2 = scmp.lt.u32.totalorder %s1567_s25, %s1563_s19  ;;  %p1571_p13 = scmp.lt.u32.totalorder %s1563_s19, %s2258_s3 }
 0x418   : > { %p1565_p12 = pnand %p1564_p11, %p2394_p3 }
 0x419   : > { %p1570_p10 = por %p1569_p2, %p1568_p4 }
 0x41a   : > { %p1566_p1 = pneg %p1565_p12 }
 0x41b   : > { %p1572_p6 = por %p1571_p13, %p1570_p10 }
 0x41d   : > { %p1573_p8 = pnand %p1572_p6, %p1566_p1 }
 0x41f   : > { %1576 = shalt.err (!%p1573_p8)
}
 0x420   : > { %1248 = dma.vmem_to_hbm [thread:$0]  (%p2394_p3), %s1016_s14, 256, %s2258_s3, %s1001_s30  }
 0x421 PF: > { %p1271_p0 = scmp.ge.s32.totalorder %s1679_s11, 2  ;;  %s1027_s26 = sand.u32 1, %s1651_s27  }
 0x422   : > { %p2395_p5 = scmp.ne.s32.totalorder %s2378_s4, 0  ;;  %s1028_s18 = scalar_lea.sflag [#allocation5], %s1027_s26 }
 0x424   : > { %p1267_p9 = pnand %p1271_p0, %p2395_p5 }
 0x426   : > { %1634 = dma.done.wait (!%p1267_p9), %s1028_s18, 256  }
 0x427   : > { %1636 = vsyncadd (!%p1267_p9), %s1028_s18, 4294967040  ;;  %s29_s11 = sadd.s32 1, %s1679_s11   ;;  %s2396_s24 = sld [smem:[#allocation17_spill]] }
 0x428   : > { %p26_p7 = scmp.ge.s32.totalorder %s29_s11, 6   ;;  %s2397_s25 = sld [smem:[#allocation18_spill]] }
 0x429   : > { %s2398_s26 = sld [smem:[#allocation25_spill]]  ;;  %s2399_s21 = sld [smem:[#allocation19_spill]] }
 0x42a   : > { %s2400_s29 = sld [smem:[#allocation27_spill]]  ;;  %s2401_s30 = sld [smem:[#allocation22_spill]] }
 0x42b   : > { %s2402_s8 = sld [smem:[#allocation23_spill]]  ;;  %s2403_s9 = sld [smem:[#allocation24_spill]] }
 0x42c   : > { %s2404_s10 = sld [smem:[#allocation26_spill]]  ;;  %s2405_s27 = smov %s1655_s28 }
 0x42d   :  { %28 = sbr.rel (!%p26_p7) target bundleno = 19 (0x13), region = 163 }
 0x42f   : > { %s2406_s28 = smov %s2399_s21 }
 0x434   :  { %1033 = vsyncpa [#allocation4], 1 }
 0x435   :  { %1035 = vsyncpa [#allocation4 + $0x1], 1 }
 0x436   :  { %1036 = vsyncpa [#allocation7], 1 }
 0x437   :  { %1038 = vsyncpa [#allocation7 + $0x1], 1 }
 0x438   :  { %1039 = vsyncpa [#allocation10], 1 }
 0x439   :  { %1041 = vsyncpa [#allocation10 + $0x1], 1 }
 0x43a   :  { %1042 = vsyncpa [#allocation5], 1 }
 0x43b   :  { %1044 = vsyncpa [#allocation5 + $0x1], 1 }

</bundles_post_ra>
